<compile_context>
chip_gen: v7x
topology: tpu7x:2x2x1
jax: 0.10.0
libtpu: 0.0.40
codegen_flags: <defaults>
</compile_context>

<pallas_src>
import jax
import jax.numpy as jnp
from jax.experimental import pallas as pl
from jax.experimental.pallas import tpu as pltpu


def perm_loss_kernel(pred_ref, gt_ref, pns_ref, gns_ref, itab_ref, jtab_ref, out_ref):
    pred = pred_ref[...].astype(jnp.float32)      # (TB, L)   L = N*M
    gt = gt_ref[...].astype(jnp.float32)          # (TB, L)
    pn = pns_ref[...]                             # (TB, 1) int32  valid rows: i < pn
    gn = gns_ref[...]                             # (TB, 1) int32  valid cols: j < gn
    i_tab = itab_ref[...]                         # (1, L) int32   i = idx // M
    j_tab = jtab_ref[...]                         # (1, L) int32   j = idx %  M

    # Validity mask for every (batch-row, flattened (i,j)) element of this block.
    mask = (i_tab < pn) & (j_tab < gn)            # (TB, L)

    # Binary cross entropy with PyTorch's log clamp at -100 (avoids -inf*0 NaNs).
    log_p = jnp.maximum(jnp.log(pred), jnp.float32(-100.0))
    log_1mp = jnp.maximum(jnp.log(1.0 - pred), jnp.float32(-100.0))
    # -(gt*log_p + (1-gt)*log_1mp) == -(gt*(log_p - log_1mp) + log_1mp)
    bce = -(gt * (log_p - log_1mp) + log_1mp)
    bce = jnp.where(mask, bce, jnp.float32(0.0))

    # Per-step partial sum; final reduction + normalization happen in the wrapper.
    out_ref[...] = jnp.full((1, 1, 1), jnp.sum(bce), dtype=jnp.float32)


def _choose_tile(B, L, itemsize):
    """Pick a batch tile TB (and padded batch) so 2 inputs x 2 buffers fit in ~8 MiB."""
    budget = 8 * 1024 * 1024                      # conservative; fits v7x scoped VMEM too
    bytes_per_row = max(1, L * itemsize)
    max_tb = max(1, budget // (4 * bytes_per_row))  # 2 inputs x 2 pipeline buffers

    if B <= max_tb:
        if B >= 16 and B % 8 == 0:
            # Keep >= 2 grid steps for DMA/compute overlap and megacore sharding.
            tb = 8
            while tb * 2 <= max_tb and B % (tb * 2) == 0 and B // (tb * 2) >= 2:
                tb *= 2
            return tb, B
        return B, B                               # block dim == full array dim is legal
    # TODO(synk): for huge N*M where even an 8-row block exceeds VMEM, the flattened
    # lane axis would additionally need tiling; not required at these sizes.
    tb = max(8, (max_tb // 8) * 8)
    b_pad = ((B + tb - 1) // tb) * tb
    return tb, b_pad


def perm_loss(pred_perm, gt_perm, pred_ns, gt_ns):
    B, N, M = pred_perm.shape
    L = N * M

    # Flatten N*M onto the lane axis (contiguous last dims -> free reshape, no copy).
    pred_flat = pred_perm.reshape(B, L)           # native dtype, no up-cast here
    gt_flat = gt_perm.reshape(B, L)
    pred_ns_i = pred_ns.astype(jnp.int32)
    gt_ns_i = gt_ns.astype(jnp.int32)

    itemsize = max(jnp.dtype(pred_perm.dtype).itemsize,
                   jnp.dtype(gt_perm.dtype).itemsize)
    TB, B_pad = _choose_tile(B, L, itemsize)

    if B_pad != B:
        pad = B_pad - B
        pred_flat = jnp.pad(pred_flat, ((0, pad), (0, 0)))  # pred=0 -> clamped, masked out
        gt_flat = jnp.pad(gt_flat, ((0, pad), (0, 0)))
        pns_p = jnp.pad(pred_ns_i, (0, pad))                # ns=0 -> mask is all-False
        gns_p = jnp.pad(gt_ns_i, (0, pad))
    else:
        pns_p, gns_p = pred_ns_i, gt_ns_i

    pns2 = pns_p.reshape(B_pad, 1)
    gns2 = gns_p.reshape(B_pad, 1)

    # Constant per-lane (row, col) index tables for the flattened layout.
    idx = jnp.arange(L, dtype=jnp.int32)
    i_tab = (idx // jnp.int32(M)).reshape(1, L)
    j_tab = (idx % jnp.int32(M)).reshape(1, L)

    G = B_pad // TB
    partials = pl.pallas_call(
        perm_loss_kernel,
        out_shape=jax.ShapeDtypeStruct((G, 1, 1), jnp.float32),
        grid_spec=pltpu.PrefetchScalarGridSpec(
            num_scalar_prefetch=0,
            grid=(G,),
            in_specs=[
                pl.BlockSpec((TB, L), lambda g: (g, 0)),   # pred rows
                pl.BlockSpec((TB, L), lambda g: (g, 0)),   # gt rows
                pl.BlockSpec((TB, 1), lambda g: (g, 0)),   # pred_ns per row
                pl.BlockSpec((TB, 1), lambda g: (g, 0)),   # gt_ns per row
                pl.BlockSpec((1, L), lambda g: (0, 0)),    # i index table (fetched once)
                pl.BlockSpec((1, L), lambda g: (0, 0)),    # j index table (fetched once)
            ],
            out_specs=pl.BlockSpec((1, 1, 1), lambda g: (g, 0, 0)),
        ),
        compiler_params=pltpu.CompilerParams(
            dimension_semantics=("parallel",)),            # no cross-step state
    )(pred_flat, gt_flat, pns2, gns2, i_tab, j_tab)

    loss = jnp.sum(partials)
    n_sum = jnp.sum(pred_ns_i).astype(jnp.float32)         # original (unpadded) pred_ns
    return loss / n_sum


def perm_loss_ref(pred_perm, gt_perm, pred_ns, gt_ns):
    """Plain-JAX reference mirroring the PyTorch loop."""
    B, N, M = pred_perm.shape
    pred = pred_perm.astype(jnp.float32)
    gt = gt_perm.astype(jnp.float32)
    log_p = jnp.maximum(jnp.log(pred), -100.0)
    log_1mp = jnp.maximum(jnp.log(1.0 - pred), -100.0)
    bce = -(gt * log_p + (1.0 - gt) * log_1mp)
    row_ids = jnp.arange(N)[None, :, None]
    col_ids = jnp.arange(M)[None, None, :]
    mask = (row_ids < pred_ns[:, None, None]) & (col_ids < gt_ns[:, None, None])
    loss = jnp.sum(jnp.where(mask, bce, 0.0))
    return loss / jnp.sum(pred_ns).astype(jnp.float32)


if __name__ == "__main__":
    key = jax.random.PRNGKey(0)
    B, N, M = 2, 16, 16

    k1, k2 = jax.random.split(key)
    # pred_perm: values in (0, 1) (row-softmax of random logits, like a Sinkhorn output)
    logits = jax.random.normal(k1, (B, N, M), dtype=jnp.float32)
    pred_perm = jax.nn.softmax(logits, axis=-1)
    # gt_perm: 0/1 permutation matrices (identity with a random row shuffle)
    perm_rows = jax.random.permutation(k2, N)
    gt_perm = jnp.stack([jnp.eye(N, M, dtype=jnp.float32),
                         jnp.eye(N, M, dtype=jnp.float32)[perm_rows]], axis=0)

    pred_ns = jnp.array([12, 16], dtype=jnp.int32)
    gt_ns = jnp.array([10, 16], dtype=jnp.int32)

    out = perm_loss(pred_perm, gt_perm, pred_ns, gt_ns)
    jax.block_until_ready(out)

    ref = perm_loss_ref(pred_perm, gt_perm, pred_ns, gt_ns)
    assert jnp.allclose(out, ref, rtol=1e-5, atol=1e-5), (out, ref)

    print("KERNEL_OK")
</pallas_src>

<mosaic_0001>
module attributes {stable_mosaic.version = 11 : i64} {
  func.func @perm_loss_kernel(%arg0: i32, %arg1: memref<2x256xf32, #tpu.memory_space<vmem>>, %arg2: memref<2x256xf32, #tpu.memory_space<vmem>>, %arg3: memref<2x1xi32, #tpu.memory_space<vmem>>, %arg4: memref<2x1xi32, #tpu.memory_space<vmem>>, %arg5: memref<1x256xi32, #tpu.memory_space<vmem>>, %arg6: memref<1x256xi32, #tpu.memory_space<vmem>>, %arg7: memref<1x1x1xf32, #tpu.memory_space<vmem>>) attributes {dimension_semantics = [#tpu.dimension_semantics<parallel>], iteration_bounds = array<i64: 1>, scalar_prefetch = 0 : i64, scratch_operands = 0 : i64, tpu.core_type = #tpu.core_type<tc>, window_params = [{transform_indices = @transform_0, window_bounds = array<i64: 2, 256>}, {transform_indices = @transform_1, window_bounds = array<i64: 2, 256>}, {transform_indices = @transform_2, window_bounds = array<i64: 2, 1>}, {transform_indices = @transform_3, window_bounds = array<i64: 2, 1>}, {pipeline_mode = #tpu.pipeline_mode<synchronous>, transform_indices = @transform_4, window_bounds = array<i64: 1, 256>}, {pipeline_mode = #tpu.pipeline_mode<synchronous>, transform_indices = @transform_5, window_bounds = array<i64: 1, 256>}, {transform_indices = @transform_6, window_bounds = array<i64: 1, 1, 1>}]} {
    %c0 = arith.constant 0 : index
    %c0_0 = arith.constant 0 : index
    %0 = vector.load %arg1[%c0, %c0_0] : memref<2x256xf32, #tpu.memory_space<vmem>>, vector<2x256xf32>
    %c0_1 = arith.constant 0 : index
    %c0_2 = arith.constant 0 : index
    %1 = vector.load %arg2[%c0_1, %c0_2] : memref<2x256xf32, #tpu.memory_space<vmem>>, vector<2x256xf32>
    %c0_3 = arith.constant 0 : index
    %c0_4 = arith.constant 0 : index
    %2 = vector.load %arg3[%c0_3, %c0_4] : memref<2x1xi32, #tpu.memory_space<vmem>>, vector<2x1xi32>
    %c0_5 = arith.constant 0 : index
    %c0_6 = arith.constant 0 : index
    %3 = vector.load %arg4[%c0_5, %c0_6] : memref<2x1xi32, #tpu.memory_space<vmem>>, vector<2x1xi32>
    %c0_7 = arith.constant 0 : index
    %c0_8 = arith.constant 0 : index
    %4 = vector.load %arg5[%c0_7, %c0_8] : memref<1x256xi32, #tpu.memory_space<vmem>>, vector<1x256xi32>
    %c0_9 = arith.constant 0 : index
    %c0_10 = arith.constant 0 : index
    %5 = vector.load %arg6[%c0_9, %c0_10] : memref<1x256xi32, #tpu.memory_space<vmem>>, vector<1x256xi32>
    %6 = vector.broadcast %4 : vector<1x256xi32> to vector<2x256xi32>
    %7 = vector.broadcast %2 : vector<2x1xi32> to vector<2x256xi32>
    %8 = arith.cmpi slt, %6, %7 : vector<2x256xi32>
    %9 = vector.broadcast %5 : vector<1x256xi32> to vector<2x256xi32>
    %10 = vector.broadcast %3 : vector<2x1xi32> to vector<2x256xi32>
    %11 = arith.cmpi slt, %9, %10 : vector<2x256xi32>
    %12 = arith.andi %8, %11 : vector<2x256xi1>
    %13 = math.log %0 : vector<2x256xf32>
    %cst = arith.constant -1.000000e+02 : f32
    %14 = vector.broadcast %cst : f32 to vector<2x256xf32>
    %15 = arith.maximumf %13, %14 : vector<2x256xf32>
    %cst_11 = arith.constant 1.000000e+00 : f32
    %16 = vector.broadcast %cst_11 : f32 to vector<2x256xf32>
    %17 = arith.subf %16, %0 : vector<2x256xf32>
    %18 = math.log %17 : vector<2x256xf32>
    %cst_12 = arith.constant -1.000000e+02 : f32
    %19 = vector.broadcast %cst_12 : f32 to vector<2x256xf32>
    %20 = arith.maximumf %18, %19 : vector<2x256xf32>
    %21 = arith.subf %15, %20 : vector<2x256xf32>
    %22 = arith.mulf %1, %21 : vector<2x256xf32>
    %23 = arith.addf %22, %20 : vector<2x256xf32>
    %cst_13 = arith.constant 0.000000e+00 : f32
    %24 = vector.broadcast %cst_13 : f32 to vector<2x256xf32>
    %25 = arith.subf %24, %23 : vector<2x256xf32>
    %cst_14 = arith.constant 0.000000e+00 : f32
    %26 = vector.broadcast %cst_14 : f32 to vector<2x256xf32>
    %27 = arith.select %12, %25, %26 : vector<2x256xi1>, vector<2x256xf32>
    %28 = vector.shape_cast %27 : vector<2x256xf32> to vector<1x2x256xf32>
    %cst_15 = arith.constant dense<0.000000e+00> : vector<1xf32>
    %29 = vector.multi_reduction <add>, %28, %cst_15 [1, 2] : vector<1x2x256xf32> to vector<1xf32>
    %30 = vector.shape_cast %29 : vector<1xf32> to vector<1x1x1xf32>
    %31 = vector.extract %30[0, 0, 0] : f32 from vector<1x1x1xf32>
    %32 = vector.broadcast %31 : f32 to vector<1x1x1xf32>
    %c0_16 = arith.constant 0 : index
    %c0_17 = arith.constant 0 : index
    %c0_18 = arith.constant 0 : index
    %33 = vector.load %arg7[%c0_16, %c0_17, %c0_18] : memref<1x1x1xf32, #tpu.memory_space<vmem>>, vector<1x1x1xf32>
    tpu.vector_store %arg7[%c0_16, %c0_17, %c0_18], %32 {strides = array<i32>} : memref<1x1x1xf32, #tpu.memory_space<vmem>>, vector<1x1x1xf32>,
    return
  }
  func.func @transform_0(%arg0: i32) -> (i32, i32) {
    %c0_i32 = arith.constant 0 : i32
    %c0_i32_0 = arith.constant 0 : i32
    return %arg0, %c0_i32 : i32, i32
  }
  func.func @transform_1(%arg0: i32) -> (i32, i32) {
    %c0_i32 = arith.constant 0 : i32
    %c0_i32_0 = arith.constant 0 : i32
    return %arg0, %c0_i32 : i32, i32
  }
  func.func @transform_2(%arg0: i32) -> (i32, i32) {
    %c0_i32 = arith.constant 0 : i32
    %c0_i32_0 = arith.constant 0 : i32
    return %arg0, %c0_i32 : i32, i32
  }
  func.func @transform_3(%arg0: i32) -> (i32, i32) {
    %c0_i32 = arith.constant 0 : i32
    %c0_i32_0 = arith.constant 0 : i32
    return %arg0, %c0_i32 : i32, i32
  }
  func.func @transform_4(%arg0: i32) -> (i32, i32) {
    %c0_i32 = arith.constant 0 : i32
    %c0_i32_0 = arith.constant 0 : i32
    %c0_i32_1 = arith.constant 0 : i32
    return %c0_i32, %c0_i32_0 : i32, i32
  }
  func.func @transform_5(%arg0: i32) -> (i32, i32) {
    %c0_i32 = arith.constant 0 : i32
    %c0_i32_0 = arith.constant 0 : i32
    %c0_i32_1 = arith.constant 0 : i32
    return %c0_i32, %c0_i32_0 : i32, i32
  }
  func.func @transform_6(%arg0: i32) -> (i32, i32, i32) {
    %c0_i32 = arith.constant 0 : i32
    %c0_i32_0 = arith.constant 0 : i32
    %c0_i32_1 = arith.constant 0 : i32
    return %arg0, %c0_i32, %c0_i32_0 : i32, i32, i32
  }
}

</mosaic_0001>

<bundles_post_ra>
// kernel: tpu_custom_call.1
= control target key start
LH: loop header
LB: loop body
LE: loop exit
PB: predicated region body
PF: predicated region fallthrough
CT: control target
= control target key end

     0   :  { %v146_v1 = vmov 0   ;;  %s214_s0 = inlined_call_operand.vmem [shape: f32[2,256], index: 0, kind: input, shape index: {}]   ;;  %s215_s1 = inlined_call_operand.vmem [shape: f32[2,256], index: 1, kind: input, shape index: {}]   ;;  %s216_s2 = inlined_call_operand.vmem [shape: s32[2,1], index: 2, kind: input, shape index: {}]   ;;  %s217_s3 = inlined_call_operand.vmem [shape: s32[2,1], index: 3, kind: input, shape index: {}]   ;;  %s218_s4 = inlined_call_operand.vmem [shape: s32[1,256], index: 4, kind: input, shape index: {}]   ;;  %s219_s5 = inlined_call_operand.vmem [shape: s32[1,256], index: 5, kind: input, shape index: {}]   ;;  %s220_s6 = inlined_call_operand.hbm [shape: f32[1,1,1], index: 6, kind: output, shape index: {}]  }
   0x1   :  { %v26_v0 = vld [vmem:[%s216_s2] sm:$0x3]  ;;  %117 = vset.pattern.permute.xlu0 %v146_v1 }
   0x2   :  { %39 = vperm.xlu0 %117, %v26_v0   ;;  %v27_v2 = vld [vmem:[%s217_s3] sm:$0x3] }
   0x3   :  { %11 = vsyncpa [#allocation3], 0  ;;  %v24_v3 = vld [vmem:[%s214_s0] sm:$0xf]  ;;  %v147_v14 = vmov 1983009808   ;;  %v30_v16 = vlaneseq }
   0x4   :  { %v61_v4 = vsub.f32 1.0, %v24_v3  ;;  %118 = vlog2.f32 %v24_v3  ;;  %v25_v12 = vld [vmem:[%s215_s1] sm:$0xf]  ;;  %v71_v15 = vunpack.c.l.s4 %v147_v14  ;;  %vm82_vm3 = vcmask 1041408   ;;  %s148_s1 = smov [#allocation2]  }
   0x5   :  { %v31_v19 = vshrl.u32 %v30_v16, 7  ;;  %v28_v23 = vld [vmem:[%s218_s4] sm:$0x3]  ;;  %s104_s4 = sshll.u32 %s148_s1, 4  ;;  %vm96_vm7 = vcmask 0   ;;  %s105_s4 = int_to_ptr.vmem [resolvable:$true] %s104_s4 }
   0x6   :  { %52 = vperm.xlu0 %117, %v27_v2   ;;  %120 = vlog2.f32 %v61_v4  ;;  %v72_v18 = vunpack.c.0.s8 %v71_v15  ;;  %v29_v25 = vld [vmem:[%s219_s5] sm:$0x3]  ;;  %s122_s30 = scalar_lea.vmem %s105_s4, 16  ;;  %s126_s7 = scalar_lea.vmem %s105_s4, 32 }
   0x7   :  { %v32_v22 = vsub.s32 0, %v31_v19  ;;  %v36_v24 = vsub.s32 1, %v31_v19  ;;  %p123_p0 = scmp.ne.s32.totalorder %s105_s4, %s122_s30  ;;  %p127_p1 = scmp.lt.s32.totalorder %s105_s4, %s105_s4 }
   0x8   :  { %v75_v21 = vsub.s32 %v72_v18, %v31_v19  ;;  %p128_p2 = scmp.lt.s32.totalorder %s126_s7, %s122_s30 }
   0x9   :  { %v33_v28 = vrot.slane %v28_v23, %v32_v22  ;;  %v46_v29 = vrot.slane %v29_v25, %v32_v22  ;;  %v50_v30 = vrot.slane %v29_v25, %v36_v24  ;;  %v37_v31 = vrot.slane %v28_v23, %v36_v24 }
   0xa   :  { %p129_p3 = por %p128_p2, %p127_p1 }
   0xc   :  { %p130_p4 = pnand %p129_p3, %p123_p0 }
   0xe   :  { %v119_v5 = vpop.eup %118 }
   0xf   :  { %v59_v7 = vmul.f32 0.6931472, %v119_v5 }
  0x10   :  { %v121_v6 = vpop.eup %120 }
  0x11   :  { %v63_v8 = vmul.f32 0.6931472, %v121_v6  ;;  %v60_v9 = vmax.f32 %v59_v7, -100.0 }
  0x13   :  { %v64_v10 = vmax.f32 %v63_v8, -100.0 }
  0x15   :  { %v65_v11 = vsub.f32 %v60_v9, %v64_v10 }
  0x17   :  { %v66_v13 = vmul.f32 %v65_v11, %v25_v12 }
  0x19   :  { %v67_v17 = vadd.f32 %v66_v13, %v64_v10 }
  0x1b   :  { %v68_v20 = vsub.f32 0.0, %v67_v17 }
  0x1d   :  { %v76_v27 = vrot.slane %v68_v20, %v75_v21 }
  0x1f   :  { %v77_v33 = vcombine.high %v76_v27, %v76_v27 }
  0x81   :  { %v40_v26 = vpop.permute.xlu0 %39 }
  0x82   :  { %vm41_vm0 = vcmp.lt.s32.totalorder %v33_v28, %v40_v26  ;;  %vm42_vm4 = vcmp.lt.s32.totalorder %v37_v31, %v40_v26 }
  0x85   :  { %v53_v32 = vpop.permute.xlu0 %52 }
  0x86   :  { %vm54_vm1 = vcmp.lt.s32.totalorder %v46_v29, %v53_v32  ;;  %vm55_vm2 = vcmp.lt.s32.totalorder %v50_v30, %v53_v32 }
  0x87   :  { %vm56_vm5 = vmand %vm41_vm0, %vm54_vm1 }
  0x88   :  { %vm57_vm6 = vmand %vm42_vm4, %vm55_vm2  ;;  %v80_v34 = vsel %vm56_vm5, %v76_v27, 0.0 }
  0x89   :  { %v81_v35 = vsel %vm57_vm6, %v77_v33, 0.0  ;;  %v83_v36 = vsel %vm82_vm3, %v80_v34, 0.0 }
  0x8a   :  { %v84_v37 = vsel %vm82_vm3, %v81_v35, 0.0 }
  0x8b   :  { %v85_v38 = vadd.f32 %v84_v37, %v83_v36 }
  0x8d   :  { %86 = vadd.xlane.f32.xlu1 %v85_v38 }
 0x11a   :  { %v87_v39 = vpop.xlane.xlu1 %86 }
 0x11b   :  { %v88_v40 = vrot.slane %v87_v39, 4 }
 0x11d   :  { %v89_v41 = vadd.f32 %v88_v40, %v87_v39 }
 0x11f   :  { %v90_v42 = vrot.slane %v89_v41, 2 }
 0x121   :  { %v91_v43 = vadd.f32 %v90_v42, %v89_v41 }
 0x123   :  { %v92_v44 = vrot.slane %v91_v43, 1 }
 0x125   :  { %v93_v45 = vadd.f32 %v92_v44, %v91_v43 }
 0x127   :  { %112 = vpush %v93_v45 }
 0x158   :  { %s113_s5 = spop %112 }
 0x159   :  { %v95_v46 = vstv %s113_s5 }
 0x15a   :  { %97 = vst.msk [vmem:[#allocation2] sm:$0x1] %vm96_vm7, %v95_v46 }
 0x15b   :  { %133 = shalt.err (!%p130_p4)
}
 0x15c   :  { %s134_s10 = scalar_lea.hbm %s220_s6, 16 }
 0x15d   :  { %p135_p5 = scmp.ne.s32.totalorder %s220_s6, %s134_s10  ;;  %p138_p6 = scmp.lt.u32.totalorder %s134_s10, %s220_s6 }
 0x15f   :  { %p140_p7 = pnand %p138_p6, %p135_p5 }
 0x161   :  { %143 = shalt.err (!%p140_p7)
}
 0x162   :  { %107 = dma.vmem_to_hbm [thread:$0]  %s105_s4, 16, %s220_s6, [#allocation3]  }
 0x163   :  { %144 = dma.done.wait [#allocation3], 16  }
 0x164   :  { %145 = vsyncadd [#allocation3], 4294967280 }
 0x165   :  { %111 = vsyncpa [#allocation3], 1 }

</bundles_post_ra>
